<compile_context>
chip_gen: v7x
topology: tpu7x:2x2x1
jax: 0.10.0
libtpu: 0.0.40
codegen_flags: <defaults>
</compile_context>

<pallas_src>
import functools

import jax
import jax.numpy as jnp
from jax.experimental import pallas as pl
from jax.experimental.pallas import tpu as pltpu


def _lstm_encoder_kernel(x_ref, w_ih_ref, w_hh_ref, b_ref, h_out_ref, gx_scr,
                         *, seq_len, batch_pad):
    """Single-invocation LSTM: hoisted input GEMM + unrolled time recurrence."""
    H4 = w_ih_ref.shape[1]
    H = H4 // 4
    B = h_out_ref.shape[0]
    T = seq_len
    Bp = batch_pad

    # ---- 1) Input projection hoisted out of the recurrence: one GEMM over
    #         all Bp*T rows, bias folded in once. -----------------------------
    gx_scr[...] = (
        jnp.dot(x_ref[...], w_ih_ref[...], preferred_element_type=jnp.float32)
        + b_ref[...])

    # Recurrent weight stays resident for the whole loop (single VMEM copy).
    w_hh = w_hh_ref[...]                                     # (H, 4H)

    # Lane mask selecting the "g" (tanh) gate lanes; hoisted out of the loop
    # (JAX does not CSE broadcasts across iterations).
    lane = jax.lax.broadcasted_iota(jnp.int32, (Bp, H4), 1)
    g_lanes = (lane >= 2 * H) & (lane < 3 * H)

    h = jnp.zeros((Bp, H), jnp.float32)
    c = jnp.zeros((Bp, H), jnp.float32)

    # ---- 2) Sequential recurrence: only the (Bp,H)x(H,4H) matmul and the
    #         elementwise gate math remain on the serial critical path.
    #         T is a small static trip count, so a fully unrolled loop gives
    #         the scheduler full visibility.
    #         TODO(synk): for long sequences switch to lax.fori_loop with a
    #         dynamic strided read instead of full unrolling. ------------------
    for t in range(T):
        # Rows of gx for time step t are b*T + t (batch-major storage):
        # one strided sublane read, no HBM transpose anywhere.
        gx_t = gx_scr[pl.ds(t, Bp, stride=T), :]             # (Bp, 4H)
        gates = gx_t + jnp.dot(h, w_hh, preferred_element_type=jnp.float32)

        # Full-tile activation with a lane select: tanh on g-lanes, sigmoid
        # on the i/f/o lanes (one tanh + one sigmoid over the whole vreg).
        act = jnp.where(g_lanes, jnp.tanh(gates), jax.nn.sigmoid(gates))

        i_g = act[:, 0 * H:1 * H]
        f_g = act[:, 1 * H:2 * H]
        g_g = act[:, 2 * H:3 * H]
        o_g = act[:, 3 * H:4 * H]

        c = f_g * c + i_g * g_g
        h = o_g * jnp.tanh(c)

    # Drop the batch-padding rows and emit the final hidden state.
    h_out_ref[...] = h[:B, :].astype(h_out_ref.dtype)


def encoder_forward(x, w_ih, w_hh, b_ih, b_hh):
    """x: (B, T, E) float32; returns h_T of shape (B, H) == hid_cell[0].squeeze(0)."""
    B, T, E = x.shape
    H4 = w_ih.shape[0]
    H = H4 // 4

    # Pad batch to a full 8-row sublane group (dense vregs / MXU rows).
    Bp = max(8, -(-B // 8) * 8)
    if Bp != B:
        x = jnp.pad(x, ((0, Bp - B), (0, 0), (0, 0)))

    # Free, metadata-only reshape (row-major) — no HBM transpose pass over x.
    x2 = x.reshape(Bp * T, E)

    # Pre-transpose weights once so the kernel does plain row-major matmuls;
    # fold the two biases into a single row vector.
    w_ih_t = jnp.transpose(w_ih)              # (E, 4H)
    w_hh_t = jnp.transpose(w_hh)              # (H, 4H)
    b = (b_ih + b_hh).reshape(1, H4)          # (1, 4H)

    kernel = functools.partial(_lstm_encoder_kernel, seq_len=T, batch_pad=Bp)
    vmem = pl.BlockSpec(memory_space=pltpu.MemorySpace.VMEM)

    # No grid: the whole sequence is processed in one invocation, so weights
    # are fetched once (single-buffered) and there is no per-step grid
    # overhead.  Total VMEM here is ~75 KiB, far below any chip's limit.
    # TODO(synk): for large E/H (H >= 1024) tile the 4H axis with a grid and
    # set vmem_limit_bytes so the kernel stays within v7x's 64 MiB VMEM, and
    # optionally run the matmuls in bf16 (f32 accumulation) for 2x MXU
    # throughput on v6e/v7x.
    return pl.pallas_call(
        kernel,
        out_shape=jax.ShapeDtypeStruct((B, H), x.dtype),
        in_specs=[vmem, vmem, vmem, vmem],
        out_specs=vmem,
        scratch_shapes=[pltpu.VMEM((Bp * T, H4), jnp.float32)],
    )(x2, w_ih_t, w_hh_t, b)


def encoder_forward_ref(x, w_ih, w_hh, b_ih, b_hh):
    """Pure-JAX reference (same equations as torch.nn.LSTM, batch_first)."""
    B, T, E = x.shape
    H = w_hh.shape[1]

    def step(carry, x_t):
        h, c = carry
        gates = x_t @ w_ih.T + h @ w_hh.T + b_ih + b_hh
        i = jax.nn.sigmoid(gates[:, 0 * H:1 * H])
        f = jax.nn.sigmoid(gates[:, 1 * H:2 * H])
        g = jnp.tanh(gates[:, 2 * H:3 * H])
        o = jax.nn.sigmoid(gates[:, 3 * H:4 * H])
        c_new = f * c + i * g
        h_new = o * jnp.tanh(c_new)
        return (h_new, c_new), None

    h0 = jnp.zeros((B, H), jnp.float32)
    c0 = jnp.zeros((B, H), jnp.float32)
    (h_T, _), _ = jax.lax.scan(step, (h0, c0), jnp.transpose(x, (1, 0, 2)))
    return h_T


if __name__ == "__main__":
    # Small shapes consistent with the module: Encoder(emb_size=32, out_size=32)
    B, T, E, H = 2, 8, 32, 32

    key = jax.random.PRNGKey(0)
    k_x, k_wi, k_wh, k_bi, k_bh = jax.random.split(key, 5)

    # Deterministic init mirroring PyTorch's U(-1/sqrt(H), 1/sqrt(H)).
    bound = 1.0 / (H ** 0.5)
    x = jax.random.normal(k_x, (B, T, E), jnp.float32)
    w_ih = jax.random.uniform(k_wi, (4 * H, E), jnp.float32, -bound, bound)
    w_hh = jax.random.uniform(k_wh, (4 * H, H), jnp.float32, -bound, bound)
    b_ih = jax.random.uniform(k_bi, (4 * H,), jnp.float32, -bound, bound)
    b_hh = jax.random.uniform(k_bh, (4 * H,), jnp.float32, -bound, bound)

    out = encoder_forward(x, w_ih, w_hh, b_ih, b_hh)
    jax.block_until_ready(out)

    ref = encoder_forward_ref(x, w_ih, w_hh, b_ih, b_hh)
    assert out.shape == (B, H)
    assert jnp.allclose(out, ref, atol=2e-5, rtol=2e-5), "mismatch vs JAX reference"

    print("KERNEL_OK")
</pallas_src>

<mosaic_0001>
module attributes {stable_mosaic.version = 11 : i64} {
  func.func @_lstm_encoder_kernel(%arg0: memref<64x32xf32, #tpu.memory_space<vmem>>, %arg1: memref<32x128xf32, #tpu.memory_space<vmem>>, %arg2: memref<32x128xf32, #tpu.memory_space<vmem>>, %arg3: memref<1x128xf32, #tpu.memory_space<vmem>>, %arg4: memref<2x32xf32, #tpu.memory_space<vmem>>, %arg5: memref<64x128xf32, #tpu.memory_space<vmem>>) attributes {dimension_semantics = [], scalar_prefetch = 0 : i64, scratch_operands = 1 : i64, tpu.core_type = #tpu.core_type<tc>} {
    %c0 = arith.constant 0 : index
    %c0_0 = arith.constant 0 : index
    %0 = vector.load %arg0[%c0, %c0_0] : memref<64x32xf32, #tpu.memory_space<vmem>>, vector<64x32xf32>
    %c0_1 = arith.constant 0 : index
    %c0_2 = arith.constant 0 : index
    %1 = vector.load %arg1[%c0_1, %c0_2] : memref<32x128xf32, #tpu.memory_space<vmem>>, vector<32x128xf32>
    %cst = arith.constant dense<0.000000e+00> : vector<64x128xf32>
    %2 = tpu.matmul %0, %1, %cst {dimension_numbers = #tpu.dot_dimension_numbers<[1], [0], [0], [1], [0, 0, 1, 1], [], []>} : vector<64x32xf32>, vector<32x128xf32>, vector<64x128xf32> -> vector<64x128xf32>
    %c0_3 = arith.constant 0 : index
    %c0_4 = arith.constant 0 : index
    %3 = vector.load %arg3[%c0_3, %c0_4] : memref<1x128xf32, #tpu.memory_space<vmem>>, vector<1x128xf32>
    %4 = vector.broadcast %3 : vector<1x128xf32> to vector<64x128xf32>
    %5 = arith.addf %2, %4 : vector<64x128xf32>
    %c0_5 = arith.constant 0 : index
    %c0_6 = arith.constant 0 : index
    %6 = vector.load %arg5[%c0_5, %c0_6] : memref<64x128xf32, #tpu.memory_space<vmem>>, vector<64x128xf32>
    tpu.vector_store %arg5[%c0_5, %c0_6], %5 {strides = array<i32>} : memref<64x128xf32, #tpu.memory_space<vmem>>, vector<64x128xf32>,
    %c0_7 = arith.constant 0 : index
    %c0_8 = arith.constant 0 : index
    %7 = vector.load %arg2[%c0_7, %c0_8] : memref<32x128xf32, #tpu.memory_space<vmem>>, vector<32x128xf32>
    %8 = tpu.iota {dimensions = array<i32: 1>} : vector<8x128xi32>
    %c64_i32 = arith.constant 64 : i32
    %9 = vector.broadcast %c64_i32 : i32 to vector<8x128xi32>
    %10 = arith.cmpi sge, %8, %9 : vector<8x128xi32>
    %c96_i32 = arith.constant 96 : i32
    %11 = vector.broadcast %c96_i32 : i32 to vector<8x128xi32>
    %12 = arith.cmpi slt, %8, %11 : vector<8x128xi32>
    %13 = arith.andi %10, %12 : vector<8x128xi1>
    %cst_9 = arith.constant 0.000000e+00 : f32
    %14 = vector.broadcast %cst_9 : f32 to vector<8x32xf32>
    %cst_10 = arith.constant 0.000000e+00 : f32
    %15 = vector.broadcast %cst_10 : f32 to vector<8x32xf32>
    %c0_11 = arith.constant 0 : index
    %c0_12 = arith.constant 0 : index
    %16 = tpu.strided_load %arg5[%c0_11, %c0_12] {strides = array<i32: 8, 1>} : memref<64x128xf32, #tpu.memory_space<vmem>>, vector<8x128xf32>
    %cst_13 = arith.constant dense<0.000000e+00> : vector<8x128xf32>
    %17 = tpu.matmul %14, %7, %cst_13 {dimension_numbers = #tpu.dot_dimension_numbers<[1], [0], [0], [1], [0, 0, 1, 1], [], []>} : vector<8x32xf32>, vector<32x128xf32>, vector<8x128xf32> -> vector<8x128xf32>
    %18 = arith.addf %16, %17 : vector<8x128xf32>
    %19 = math.tanh %18 : vector<8x128xf32>
    %20 = arith.negf %18 : vector<8x128xf32>
    %21 = math.exp %20 : vector<8x128xf32>
    %cst_14 = arith.constant 1.000000e+00 : f32
    %22 = vector.broadcast %cst_14 : f32 to vector<8x128xf32>
    %23 = arith.addf %22, %21 : vector<8x128xf32>
    %24 = arith.divf %22, %23 : vector<8x128xf32>
    %25 = arith.select %13, %19, %24 : vector<8x128xi1>, vector<8x128xf32>
    %26 = vector.extract_strided_slice %25 {offsets = [0, 0], sizes = [8, 32], strides = [1, 1]} : vector<8x128xf32> to vector<8x32xf32>
    %27 = vector.extract_strided_slice %25 {offsets = [0, 32], sizes = [8, 32], strides = [1, 1]} : vector<8x128xf32> to vector<8x32xf32>
    %28 = vector.extract_strided_slice %25 {offsets = [0, 64], sizes = [8, 32], strides = [1, 1]} : vector<8x128xf32> to vector<8x32xf32>
    %29 = vector.extract_strided_slice %25 {offsets = [0, 96], sizes = [8, 32], strides = [1, 1]} : vector<8x128xf32> to vector<8x32xf32>
    %30 = arith.mulf %27, %15 : vector<8x32xf32>
    %31 = arith.mulf %26, %28 : vector<8x32xf32>
    %32 = arith.addf %30, %31 : vector<8x32xf32>
    %33 = math.tanh %32 : vector<8x32xf32>
    %34 = arith.mulf %29, %33 : vector<8x32xf32>
    %c1 = arith.constant 1 : index
    %c0_15 = arith.constant 0 : index
    %35 = tpu.strided_load %arg5[%c1, %c0_15] {strides = array<i32: 8, 1>} : memref<64x128xf32, #tpu.memory_space<vmem>>, vector<8x128xf32>
    %cst_16 = arith.constant dense<0.000000e+00> : vector<8x128xf32>
    %36 = tpu.matmul %34, %7, %cst_16 {dimension_numbers = #tpu.dot_dimension_numbers<[1], [0], [0], [1], [0, 0, 1, 1], [], []>} : vector<8x32xf32>, vector<32x128xf32>, vector<8x128xf32> -> vector<8x128xf32>
    %37 = arith.addf %35, %36 : vector<8x128xf32>
    %38 = math.tanh %37 : vector<8x128xf32>
    %39 = arith.negf %37 : vector<8x128xf32>
    %40 = math.exp %39 : vector<8x128xf32>
    %cst_17 = arith.constant 1.000000e+00 : f32
    %41 = vector.broadcast %cst_17 : f32 to vector<8x128xf32>
    %42 = arith.addf %41, %40 : vector<8x128xf32>
    %43 = arith.divf %41, %42 : vector<8x128xf32>
    %44 = arith.select %13, %38, %43 : vector<8x128xi1>, vector<8x128xf32>
    %45 = vector.extract_strided_slice %44 {offsets = [0, 0], sizes = [8, 32], strides = [1, 1]} : vector<8x128xf32> to vector<8x32xf32>
    %46 = vector.extract_strided_slice %44 {offsets = [0, 32], sizes = [8, 32], strides = [1, 1]} : vector<8x128xf32> to vector<8x32xf32>
    %47 = vector.extract_strided_slice %44 {offsets = [0, 64], sizes = [8, 32], strides = [1, 1]} : vector<8x128xf32> to vector<8x32xf32>
    %48 = vector.extract_strided_slice %44 {offsets = [0, 96], sizes = [8, 32], strides = [1, 1]} : vector<8x128xf32> to vector<8x32xf32>
    %49 = arith.mulf %46, %32 : vector<8x32xf32>
    %50 = arith.mulf %45, %47 : vector<8x32xf32>
    %51 = arith.addf %49, %50 : vector<8x32xf32>
    %52 = math.tanh %51 : vector<8x32xf32>
    %53 = arith.mulf %48, %52 : vector<8x32xf32>
    %c2 = arith.constant 2 : index
    %c0_18 = arith.constant 0 : index
    %54 = tpu.strided_load %arg5[%c2, %c0_18] {strides = array<i32: 8, 1>} : memref<64x128xf32, #tpu.memory_space<vmem>>, vector<8x128xf32>
    %cst_19 = arith.constant dense<0.000000e+00> : vector<8x128xf32>
    %55 = tpu.matmul %53, %7, %cst_19 {dimension_numbers = #tpu.dot_dimension_numbers<[1], [0], [0], [1], [0, 0, 1, 1], [], []>} : vector<8x32xf32>, vector<32x128xf32>, vector<8x128xf32> -> vector<8x128xf32>
    %56 = arith.addf %54, %55 : vector<8x128xf32>
    %57 = math.tanh %56 : vector<8x128xf32>
    %58 = arith.negf %56 : vector<8x128xf32>
    %59 = math.exp %58 : vector<8x128xf32>
    %cst_20 = arith.constant 1.000000e+00 : f32
    %60 = vector.broadcast %cst_20 : f32 to vector<8x128xf32>
    %61 = arith.addf %60, %59 : vector<8x128xf32>
    %62 = arith.divf %60, %61 : vector<8x128xf32>
    %63 = arith.select %13, %57, %62 : vector<8x128xi1>, vector<8x128xf32>
    %64 = vector.extract_strided_slice %63 {offsets = [0, 0], sizes = [8, 32], strides = [1, 1]} : vector<8x128xf32> to vector<8x32xf32>
    %65 = vector.extract_strided_slice %63 {offsets = [0, 32], sizes = [8, 32], strides = [1, 1]} : vector<8x128xf32> to vector<8x32xf32>
    %66 = vector.extract_strided_slice %63 {offsets = [0, 64], sizes = [8, 32], strides = [1, 1]} : vector<8x128xf32> to vector<8x32xf32>
    %67 = vector.extract_strided_slice %63 {offsets = [0, 96], sizes = [8, 32], strides = [1, 1]} : vector<8x128xf32> to vector<8x32xf32>
    %68 = arith.mulf %65, %51 : vector<8x32xf32>
    %69 = arith.mulf %64, %66 : vector<8x32xf32>
    %70 = arith.addf %68, %69 : vector<8x32xf32>
    %71 = math.tanh %70 : vector<8x32xf32>
    %72 = arith.mulf %67, %71 : vector<8x32xf32>
    %c3 = arith.constant 3 : index
    %c0_21 = arith.constant 0 : index
    %73 = tpu.strided_load %arg5[%c3, %c0_21] {strides = array<i32: 8, 1>} : memref<64x128xf32, #tpu.memory_space<vmem>>, vector<8x128xf32>
    %cst_22 = arith.constant dense<0.000000e+00> : vector<8x128xf32>
    %74 = tpu.matmul %72, %7, %cst_22 {dimension_numbers = #tpu.dot_dimension_numbers<[1], [0], [0], [1], [0, 0, 1, 1], [], []>} : vector<8x32xf32>, vector<32x128xf32>, vector<8x128xf32> -> vector<8x128xf32>
    %75 = arith.addf %73, %74 : vector<8x128xf32>
    %76 = math.tanh %75 : vector<8x128xf32>
    %77 = arith.negf %75 : vector<8x128xf32>
    %78 = math.exp %77 : vector<8x128xf32>
    %cst_23 = arith.constant 1.000000e+00 : f32
    %79 = vector.broadcast %cst_23 : f32 to vector<8x128xf32>
    %80 = arith.addf %79, %78 : vector<8x128xf32>
    %81 = arith.divf %79, %80 : vector<8x128xf32>
    %82 = arith.select %13, %76, %81 : vector<8x128xi1>, vector<8x128xf32>
    %83 = vector.extract_strided_slice %82 {offsets = [0, 0], sizes = [8, 32], strides = [1, 1]} : vector<8x128xf32> to vector<8x32xf32>
    %84 = vector.extract_strided_slice %82 {offsets = [0, 32], sizes = [8, 32], strides = [1, 1]} : vector<8x128xf32> to vector<8x32xf32>
    %85 = vector.extract_strided_slice %82 {offsets = [0, 64], sizes = [8, 32], strides = [1, 1]} : vector<8x128xf32> to vector<8x32xf32>
    %86 = vector.extract_strided_slice %82 {offsets = [0, 96], sizes = [8, 32], strides = [1, 1]} : vector<8x128xf32> to vector<8x32xf32>
    %87 = arith.mulf %84, %70 : vector<8x32xf32>
    %88 = arith.mulf %83, %85 : vector<8x32xf32>
    %89 = arith.addf %87, %88 : vector<8x32xf32>
    %90 = math.tanh %89 : vector<8x32xf32>
    %91 = arith.mulf %86, %90 : vector<8x32xf32>
    %c4 = arith.constant 4 : index
    %c0_24 = arith.constant 0 : index
    %92 = tpu.strided_load %arg5[%c4, %c0_24] {strides = array<i32: 8, 1>} : memref<64x128xf32, #tpu.memory_space<vmem>>, vector<8x128xf32>
    %cst_25 = arith.constant dense<0.000000e+00> : vector<8x128xf32>
    %93 = tpu.matmul %91, %7, %cst_25 {dimension_numbers = #tpu.dot_dimension_numbers<[1], [0], [0], [1], [0, 0, 1, 1], [], []>} : vector<8x32xf32>, vector<32x128xf32>, vector<8x128xf32> -> vector<8x128xf32>
    %94 = arith.addf %92, %93 : vector<8x128xf32>
    %95 = math.tanh %94 : vector<8x128xf32>
    %96 = arith.negf %94 : vector<8x128xf32>
    %97 = math.exp %96 : vector<8x128xf32>
    %cst_26 = arith.constant 1.000000e+00 : f32
    %98 = vector.broadcast %cst_26 : f32 to vector<8x128xf32>
    %99 = arith.addf %98, %97 : vector<8x128xf32>
    %100 = arith.divf %98, %99 : vector<8x128xf32>
    %101 = arith.select %13, %95, %100 : vector<8x128xi1>, vector<8x128xf32>
    %102 = vector.extract_strided_slice %101 {offsets = [0, 0], sizes = [8, 32], strides = [1, 1]} : vector<8x128xf32> to vector<8x32xf32>
    %103 = vector.extract_strided_slice %101 {offsets = [0, 32], sizes = [8, 32], strides = [1, 1]} : vector<8x128xf32> to vector<8x32xf32>
    %104 = vector.extract_strided_slice %101 {offsets = [0, 64], sizes = [8, 32], strides = [1, 1]} : vector<8x128xf32> to vector<8x32xf32>
    %105 = vector.extract_strided_slice %101 {offsets = [0, 96], sizes = [8, 32], strides = [1, 1]} : vector<8x128xf32> to vector<8x32xf32>
    %106 = arith.mulf %103, %89 : vector<8x32xf32>
    %107 = arith.mulf %102, %104 : vector<8x32xf32>
    %108 = arith.addf %106, %107 : vector<8x32xf32>
    %109 = math.tanh %108 : vector<8x32xf32>
    %110 = arith.mulf %105, %109 : vector<8x32xf32>
    %c5 = arith.constant 5 : index
    %c0_27 = arith.constant 0 : index
    %111 = tpu.strided_load %arg5[%c5, %c0_27] {strides = array<i32: 8, 1>} : memref<64x128xf32, #tpu.memory_space<vmem>>, vector<8x128xf32>
    %cst_28 = arith.constant dense<0.000000e+00> : vector<8x128xf32>
    %112 = tpu.matmul %110, %7, %cst_28 {dimension_numbers = #tpu.dot_dimension_numbers<[1], [0], [0], [1], [0, 0, 1, 1], [], []>} : vector<8x32xf32>, vector<32x128xf32>, vector<8x128xf32> -> vector<8x128xf32>
    %113 = arith.addf %111, %112 : vector<8x128xf32>
    %114 = math.tanh %113 : vector<8x128xf32>
    %115 = arith.negf %113 : vector<8x128xf32>
    %116 = math.exp %115 : vector<8x128xf32>
    %cst_29 = arith.constant 1.000000e+00 : f32
    %117 = vector.broadcast %cst_29 : f32 to vector<8x128xf32>
    %118 = arith.addf %117, %116 : vector<8x128xf32>
    %119 = arith.divf %117, %118 : vector<8x128xf32>
    %120 = arith.select %13, %114, %119 : vector<8x128xi1>, vector<8x128xf32>
    %121 = vector.extract_strided_slice %120 {offsets = [0, 0], sizes = [8, 32], strides = [1, 1]} : vector<8x128xf32> to vector<8x32xf32>
    %122 = vector.extract_strided_slice %120 {offsets = [0, 32], sizes = [8, 32], strides = [1, 1]} : vector<8x128xf32> to vector<8x32xf32>
    %123 = vector.extract_strided_slice %120 {offsets = [0, 64], sizes = [8, 32], strides = [1, 1]} : vector<8x128xf32> to vector<8x32xf32>
    %124 = vector.extract_strided_slice %120 {offsets = [0, 96], sizes = [8, 32], strides = [1, 1]} : vector<8x128xf32> to vector<8x32xf32>
    %125 = arith.mulf %122, %108 : vector<8x32xf32>
    %126 = arith.mulf %121, %123 : vector<8x32xf32>
    %127 = arith.addf %125, %126 : vector<8x32xf32>
    %128 = math.tanh %127 : vector<8x32xf32>
    %129 = arith.mulf %124, %128 : vector<8x32xf32>
    %c6 = arith.constant 6 : index
    %c0_30 = arith.constant 0 : index
    %130 = tpu.strided_load %arg5[%c6, %c0_30] {strides = array<i32: 8, 1>} : memref<64x128xf32, #tpu.memory_space<vmem>>, vector<8x128xf32>
    %cst_31 = arith.constant dense<0.000000e+00> : vector<8x128xf32>
    %131 = tpu.matmul %129, %7, %cst_31 {dimension_numbers = #tpu.dot_dimension_numbers<[1], [0], [0], [1], [0, 0, 1, 1], [], []>} : vector<8x32xf32>, vector<32x128xf32>, vector<8x128xf32> -> vector<8x128xf32>
    %132 = arith.addf %130, %131 : vector<8x128xf32>
    %133 = math.tanh %132 : vector<8x128xf32>
    %134 = arith.negf %132 : vector<8x128xf32>
    %135 = math.exp %134 : vector<8x128xf32>
    %cst_32 = arith.constant 1.000000e+00 : f32
    %136 = vector.broadcast %cst_32 : f32 to vector<8x128xf32>
    %137 = arith.addf %136, %135 : vector<8x128xf32>
    %138 = arith.divf %136, %137 : vector<8x128xf32>
    %139 = arith.select %13, %133, %138 : vector<8x128xi1>, vector<8x128xf32>
    %140 = vector.extract_strided_slice %139 {offsets = [0, 0], sizes = [8, 32], strides = [1, 1]} : vector<8x128xf32> to vector<8x32xf32>
    %141 = vector.extract_strided_slice %139 {offsets = [0, 32], sizes = [8, 32], strides = [1, 1]} : vector<8x128xf32> to vector<8x32xf32>
    %142 = vector.extract_strided_slice %139 {offsets = [0, 64], sizes = [8, 32], strides = [1, 1]} : vector<8x128xf32> to vector<8x32xf32>
    %143 = vector.extract_strided_slice %139 {offsets = [0, 96], sizes = [8, 32], strides = [1, 1]} : vector<8x128xf32> to vector<8x32xf32>
    %144 = arith.mulf %141, %127 : vector<8x32xf32>
    %145 = arith.mulf %140, %142 : vector<8x32xf32>
    %146 = arith.addf %144, %145 : vector<8x32xf32>
    %147 = math.tanh %146 : vector<8x32xf32>
    %148 = arith.mulf %143, %147 : vector<8x32xf32>
    %c7 = arith.constant 7 : index
    %c0_33 = arith.constant 0 : index
    %149 = tpu.strided_load %arg5[%c7, %c0_33] {strides = array<i32: 8, 1>} : memref<64x128xf32, #tpu.memory_space<vmem>>, vector<8x128xf32>
    %cst_34 = arith.constant dense<0.000000e+00> : vector<8x128xf32>
    %150 = tpu.matmul %148, %7, %cst_34 {dimension_numbers = #tpu.dot_dimension_numbers<[1], [0], [0], [1], [0, 0, 1, 1], [], []>} : vector<8x32xf32>, vector<32x128xf32>, vector<8x128xf32> -> vector<8x128xf32>
    %151 = arith.addf %149, %150 : vector<8x128xf32>
    %152 = math.tanh %151 : vector<8x128xf32>
    %153 = arith.negf %151 : vector<8x128xf32>
    %154 = math.exp %153 : vector<8x128xf32>
    %cst_35 = arith.constant 1.000000e+00 : f32
    %155 = vector.broadcast %cst_35 : f32 to vector<8x128xf32>
    %156 = arith.addf %155, %154 : vector<8x128xf32>
    %157 = arith.divf %155, %156 : vector<8x128xf32>
    %158 = arith.select %13, %152, %157 : vector<8x128xi1>, vector<8x128xf32>
    %159 = vector.extract_strided_slice %158 {offsets = [0, 0], sizes = [8, 32], strides = [1, 1]} : vector<8x128xf32> to vector<8x32xf32>
    %160 = vector.extract_strided_slice %158 {offsets = [0, 32], sizes = [8, 32], strides = [1, 1]} : vector<8x128xf32> to vector<8x32xf32>
    %161 = vector.extract_strided_slice %158 {offsets = [0, 64], sizes = [8, 32], strides = [1, 1]} : vector<8x128xf32> to vector<8x32xf32>
    %162 = vector.extract_strided_slice %158 {offsets = [0, 96], sizes = [8, 32], strides = [1, 1]} : vector<8x128xf32> to vector<8x32xf32>
    %163 = arith.mulf %160, %146 : vector<8x32xf32>
    %164 = arith.mulf %159, %161 : vector<8x32xf32>
    %165 = arith.addf %163, %164 : vector<8x32xf32>
    %166 = math.tanh %165 : vector<8x32xf32>
    %167 = arith.mulf %162, %166 : vector<8x32xf32>
    %168 = vector.extract_strided_slice %167 {offsets = [0, 0], sizes = [2, 32], strides = [1, 1]} : vector<8x32xf32> to vector<2x32xf32>
    %c0_36 = arith.constant 0 : index
    %c0_37 = arith.constant 0 : index
    %169 = vector.load %arg4[%c0_36, %c0_37] : memref<2x32xf32, #tpu.memory_space<vmem>>, vector<2x32xf32>
    tpu.vector_store %arg4[%c0_36, %c0_37], %168 {strides = array<i32>} : memref<2x32xf32, #tpu.memory_space<vmem>>, vector<2x32xf32>,
    return
  }
}

</mosaic_0001>

<bundles_post_ra>
// kernel: tpu_custom_call.1
= control target key start
LH: loop header
LB: loop body
LE: loop exit
PB: predicated region body
PF: predicated region fallthrough
CT: control target
= control target key end

     0   :  { %vm37_vm0 = vcmask 261120   ;;  %v1375_v6 = vmov 0.0|0.0   ;;  %vm1376_vm1 = vmmov 0   ;;  %v1377_v8 = vmov 0.0   ;;  %s1589_s0 = inlined_call_operand.vmem [shape: f32[64,32], index: 0, kind: input, shape index: {}]   ;;  %s1590_s1 = inlined_call_operand.vmem [shape: f32[32,128], index: 1, kind: input, shape index: {}]   ;;  %s1591_s2 = inlined_call_operand.vmem [shape: f32[32,128], index: 2, kind: input, shape index: {}]   ;;  %s1592_s3 = inlined_call_operand.vmem [shape: f32[1,128], index: 3, kind: input, shape index: {}]   ;;  %s1593_s4 = inlined_call_operand.hbm [shape: f32[2,32], index: 4, kind: output, shape index: {}]  }
   0x1   :  { %v26_v0 = vld [vmem:[%s1590_s1] sm:$0xff]  ;;  %v27_v1 = vld [vmem:[%s1590_s1 + $0x8] sm:$0xff]  ;;  %v28_v2 = vld [vmem:[%s1590_s1 + $0x10] sm:$0xff]  ;;  %1233 = vmatprep.subr.bf16.mxu1 %v1375_v6  ;;  %1145 = vmatprep.mubr.msk.f32.mxu1 %vm1376_vm1, %v1377_v8 }
   0x2   :  { %v1225_v3 = vpack.c.bf16 %v27_v1, %v26_v0  ;;  %v29_v4 = vld [vmem:[%s1590_s1 + $0x18] sm:$0xff]  ;;  %v18_v5 = vld [vmem:[%s1589_s0] sm:$0xff]  ;;  %v176_v10 = vld [vmem:[%s1591_s2 + $0x8] sm:$0xff] }
   0x3   :  { %v1229_v7 = vpack.c.bf16 %v29_v4, %v28_v2  ;;  %1125 = vmatprep.mubr.msk.f32.mxu0 %vm37_vm0, %v18_v5  ;;  %v175_v9 = vld [vmem:[%s1591_s2] sm:$0xff]  ;;  %v177_v11 = vld [vmem:[%s1591_s2 + $0x10] sm:$0xff]  ;;  %v178_v13 = vld [vmem:[%s1591_s2 + $0x18] sm:$0xff] }
   0x4   :  { %1226 = vmatprep.subr.bf16.mxu0 %v1225_v3  ;;  %v1434_v12 = vpack.c.bf16 %v176_v10, %v175_v9 }
   0x5   :  { %1228 = vmatpush3.bf16.msra.mxu0 %v1225_v3 }
   0x6   :  { %1230 = vmatprep.subr.bf16.mxu0 %v1229_v7 }
   0x7   :  { %9 = vsyncpa [#allocation4], 0  ;;  %1235 = vmatpush3.bf16.msra.mxu1 %v1434_v12  ;;  %v1440_v14 = vpack.c.bf16 %v178_v13, %v177_v11  ;;  %v19_v15 = vld [vmem:[%s1589_s0 + $0x8] sm:$0xff]  ;;  %v20_v16 = vld [vmem:[%s1589_s0 + $0x10] sm:$0xff]  ;;  %v179_v47 = vlaneseq  ;;  %s1380_s21 = smov [#allocation3]   ;;  %vm1025_vm5 = vcmask 254976  }
   0x8   :  { %1236 = vmatprep.subr.bf16.mxu1 %v1375_v6  ;;  %v21_v17 = vld [vmem:[%s1589_s0 + $0x18] sm:$0xff]  ;;  %v22_v18 = vld [vmem:[%s1589_s0 + $0x20] sm:$0xff]  ;;  %v23_v19 = vld [vmem:[%s1589_s0 + $0x28] sm:$0xff]  ;;  %s1033_s22 = sshll.u32 %s1380_s21, 4  ;;  %s1034_s22 = int_to_ptr.vmem [resolvable:$true] %s1033_s22 }
   0x9   :  { %1232 = vmatpush3.bf16.msra.mxu0 %v1229_v7  ;;  %v24_v20 = vld [vmem:[%s1589_s0 + $0x30] sm:$0xff]  ;;  %v25_v21 = vld [vmem:[%s1589_s0 + $0x38] sm:$0xff]  ;;  %v1041_v22 = vld [vmem:[%s1592_s3] ss:$0 sm:$0xff]  ;;  %v180_v49 = vand.u32 127, %v179_v47  ;;  %s1378_s0 = smov 64   ;;  %p1356_p1 = scmp.lt.s32.totalorder %s1034_s22, %s1034_s22 }
   0xa   :  { %1245 = vmatprep.subr.bf16.mxu0 %v1375_v6  ;;  %s1379_s3 = smov 32   ;;  %s1351_s23 = scalar_lea.vmem %s1034_s22, 32 }
   0xb   :  { %1238 = vmatpush3.bf16.msra.mxu1 %v1440_v14  ;;  %vm181_vm2 = vcmp.ge.s32.totalorder %v180_v49, 64  ;;  %vm182_vm3 = vcmp.lt.s32.totalorder %v180_v49, 96  ;;  %p1352_p0 = scmp.ne.s32.totalorder %s1034_s22, %s1351_s23  ;;  %p1357_p2 = scmp.lt.s32.totalorder %s1351_s23, %s1351_s23 }
   0xc   :  { %1126 = vmatmul.mubr.msk.f32.vlgmr.msra.gmra.mrb[0].mxu0 %vm37_vm0, %v19_v15  ;;  %1239 = vmatprep.subr.bf16.mxu1 %v1375_v6  ;;  %vm1490_vm4 = vmand %vm181_vm2, %vm182_vm3 }
   0xd   :  { %1128 = vmatprep.mubr.msk.f32.mxu0 %vm37_vm0, %v20_v16  ;;  %1247 = vmatpush3.bf16.msra.mxu0 %v1434_v12  ;;  %p1358_p3 = por %p1357_p2, %p1356_p1 }
   0xe   :  { %1146 = vmatmul.mubr.f32.vlgmr.msra.gmra.mrb[0].mxu1 %v1377_v8  ;;  %1248 = vmatprep.subr.bf16.mxu0 %v1375_v6 }
   0xf   :  { %1241 = vmatpush3.bf16.msra.mxu1 %v1434_v12  ;;  %1156 = vmatprep.mubr.msk.f32.mxu1 %vm1376_vm1, %v1377_v8  ;;  %p1359_p4 = pnand %p1358_p3, %p1352_p0 }
  0x10   :  { %1129 = vmatmul.mubr.msk.f32.gmra.mrb[2].mxu0 %vm37_vm0, %v21_v17  ;;  %1242 = vmatprep.subr.bf16.mxu1 %v1375_v6 }
  0x11   :  { %1131 = vmatprep.mubr.msk.f32.mxu0 %vm37_vm0, %v22_v18  ;;  %1250 = vmatpush3.bf16.msra.mxu0 %v1440_v14 }
  0x12   :  { %1257 = vmatprep.subr.bf16.mxu0 %v1375_v6 }
  0x13   :  { %1244 = vmatpush3.bf16.msra.mxu1 %v1440_v14 }
  0x14   :  { %1132 = vmatmul.mubr.msk.f32.gmra.mrb[4].mxu0 %vm37_vm0, %v23_v19  ;;  %1251 = vmatprep.subr.bf16.mxu1 %v1375_v6 }
  0x15   :  { %1134 = vmatprep.mubr.msk.f32.mxu0 %vm37_vm0, %v24_v20 }
  0x18   :  { %1135 = vmatmul.mubr.msk.f32.gmra.mrb[6].mxu0 %vm37_vm0, %v25_v21 }
  0x19   :  { %1167 = vmatprep.mubr.msk.f32.mxu0 %vm1376_vm1, %v1377_v8 }
  0xdf   :  { %v1127_v23 = vpop.f32.mrb[0].mxu0 }
  0xe0   :  { %v134_v24 = vadd.f32 %v1127_v23, %v1041_v22  ;;  %v128_v25 = vpop.f32.mrb[1].mxu0 }
  0xe1   :  { %v129_v26 = vadd.f32 %v1041_v22, %v128_v25  ;;  %v256_v27 = vpop.f32.mrb[0].mxu1 }
  0xe2   :  { %168 = vst [vmem:[#allocation2 + $0x8] sm:$0xff] %v134_v24  ;;  %v1147_v29 = vpop.f32.mrb[1].mxu1 }
  0xe3   :  { %167 = vst [vmem:[#allocation2] sm:$0xff] %v129_v26  ;;  %v1130_v28 = vpop.f32.mrb[2].mxu0 }
  0xe4   :  { %v144_v30 = vadd.f32 %v1130_v28, %v1041_v22  ;;  %v138_v31 = vpop.f32.mrb[3].mxu0 }
  0xe5   :  { %v139_v32 = vadd.f32 %v1041_v22, %v138_v31 }
  0xe6   :  { %170 = vst [vmem:[#allocation2 + $0x18] sm:$0xff] %v144_v30 }
  0xe7   :  { %169 = vst [vmem:[#allocation2 + $0x10] sm:$0xff] %v139_v32  ;;  %v1133_v33 = vpop.f32.mrb[4].mxu0 }
  0xe8   :  { %v154_v34 = vadd.f32 %v1133_v33, %v1041_v22  ;;  %v148_v35 = vpop.f32.mrb[5].mxu0 }
  0xe9   :  { %v149_v36 = vadd.f32 %v1041_v22, %v148_v35 }
  0xea   :  { %172 = vst [vmem:[#allocation2 + $0x28] sm:$0xff] %v154_v34 }
  0xeb   :  { %171 = vst [vmem:[#allocation2 + $0x20] sm:$0xff] %v149_v36  ;;  %v1136_v37 = vpop.f32.mrb[6].mxu0 }
  0xec   :  { %v164_v38 = vadd.f32 %v1136_v37, %v1041_v22  ;;  %v158_v39 = vpop.f32.mrb[7].mxu0 }
  0xed   :  { %v159_v40 = vadd.f32 %v1041_v22, %v158_v39 }
  0xee   :  { %174 = vst [vmem:[#allocation2 + $0x38] sm:$0xff] %v164_v38  ;;  %v184_v41 = vld [vmem:[#allocation2] ss:$8 sm:$0xf] }
  0xef   :  { %173 = vst [vmem:[#allocation2 + $0x30] sm:$0xff] %v159_v40  ;;  %v287_v0 = vld [vmem:[#allocation2 + $0x1] ss:$8 sm:$0xf] }
  0xf0   :  { %v392_v25 = vld [vmem:[#allocation2 + $0x2] ss:$8 sm:$0xf] }
  0xf6   :  { %v185_v42 = vld [vmem:[#allocation2] ss:$8 sm:$0xf0]  ;;  %v288_v63 = vld [vmem:[#allocation2 + $0x1] ss:$8 sm:$0xf0] }
  0xf7   :  { %v186_v43 = vor.u32 %v185_v42, %v184_v41  ;;  %v289_v1 = vor.u32 %v288_v63, %v287_v0  ;;  %v393_v24 = vld [vmem:[#allocation2 + $0x2] ss:$8 sm:$0xf0] }
  0xf8   :  { %v394_v26 = vor.u32 %v393_v24, %v392_v25 }
  0xf9   :  { %v260_v44 = vadd.f32 %v256_v27, %v186_v43 }
  0xfb   :  { %v1050_v45 = vmul.f32 -1.442695, %v260_v44 }
  0xfd   :  { %1287 = vpow2.f32 %v1050_v45  ;;  %v498_v45 = vld [vmem:[#allocation2 + $0x3] ss:$8 sm:$0xf0] }
  0xfe   :  { %1289 = vtanh.f32 %v260_v44 }
 0x107   :  { %v1288_v46 = vpop.eup %1287 }
 0x108   :  { %v265_v48 = vadd.f32 1.0, %v1288_v46  ;;  %v1290_v51 = vpop.eup %1289  ;;  %v497_v46 = vld [vmem:[#allocation2 + $0x3] ss:$8 sm:$0xf] }
 0x109   :  { %v499_v47 = vor.u32 %v498_v45, %v497_v46  ;;  %v813_v45 = vld [vmem:[#allocation2 + $0x6] ss:$8 sm:$0xf0] }
 0x10a   :  { %1291 = vrcp.f32 %v265_v48  ;;  %v812_v46 = vld [vmem:[#allocation2 + $0x6] ss:$8 sm:$0xf] }
 0x114   :  { %v1292_v52 = vpop.eup %1291 }
 0x115   :  { %v268_v53 = vsel %vm1490_vm4, %v1290_v51, %v1292_v52 }
 0x116   :  { %271 = vrot.lane.b32.xlu0 %v268_v53, %s1378_s0  ;;  %v269_v56 = vmul.f32 0.0, %v268_v53 }
 0x188   :  { %v272_v54 = vpop.permute.xlu0 %271 }
 0x189   :  { %v274_v55 = vmul.f32 %v272_v54, %v268_v53 }
 0x18b   :  { %276 = vrot.lane.b32.xlu0 %v274_v55, %s1379_s3 }
 0x1fd   :  { %v277_v57 = vpop.permute.xlu0 %276 }
 0x1fe   :  { %v279_v58 = vadd.f32 %v277_v57, %v269_v56 }
 0x200   :  { %1293 = vtanh.f32 %v279_v58 }
 0x20a   :  { %v1294_v59 = vpop.eup %1293 }
 0x20b   :  { %282 = vrot.lane.b32.xlu1 %v1294_v59, %s1378_s0 }
 0x27d   :  { %v283_v60 = vpop.permute.xlu1 %282 }
 0x27e   :  { %v285_v61 = vmul.f32 %v283_v60, %v268_v53 }
 0x280   :  { %291 = vrot.lane.b32.xlu1 %v285_v61, %s1379_s3 }
 0x2f2   :  { %v292_v62 = vpop.permute.xlu1 %291 }
 0x2f3   :  { %1157 = vmatmul.mubr.msk.f32.vlgmr.msra.gmra.mrb[2].mxu1 %vm37_vm0, %v292_v62 }
 0x2f4   :  { %1253 = vmatpush3.bf16.msra.mxu1 %v1434_v12  ;;  %1178 = vmatprep.mubr.msk.f32.mxu1 %vm1376_vm1, %v1377_v8 }
 0x2f5   :  { %1254 = vmatprep.subr.bf16.mxu1 %v1375_v6 }
 0x2f8   :  { %1256 = vmatpush3.bf16.msra.mxu1 %v1440_v14 }
 0x2f9   :  { %1263 = vmatprep.subr.bf16.mxu1 %v1375_v6 }
 0x3c6   :  { %v361_v2 = vpop.f32.mrb[2].mxu1 }
 0x3c7   :  { %v365_v3 = vadd.f32 %v361_v2, %v289_v1  ;;  %v1158_v4 = vpop.f32.mrb[3].mxu1 }
 0x3c8   :  { %v602_v4 = vld [vmem:[#allocation2 + $0x4] ss:$8 sm:$0xf] }
 0x3c9   :  { %v1052_v5 = vmul.f32 -1.442695, %v365_v3 }
 0x3cb   :  { %1295 = vpow2.f32 %v1052_v5 }
 0x3cc   :  { %1297 = vtanh.f32 %v365_v3  ;;  %v603_v3 = vld [vmem:[#allocation2 + $0x4] ss:$8 sm:$0xf0] }
 0x3cd   :  { %v604_v5 = vor.u32 %v603_v3, %v602_v4  ;;  %v918_v3 = vld [vmem:[#allocation2 + $0x7] ss:$8 sm:$0xf0] }
 0x3ce   :  { %v917_v4 = vld [vmem:[#allocation2 + $0x7] ss:$8 sm:$0xf] }
 0x3d5   :  { %v1296_v7 = vpop.eup %1295 }
 0x3d6   :  { %v370_v9 = vadd.f32 1.0, %v1296_v7  ;;  %v1298_v10 = vpop.eup %1297 }
 0x3d8   :  { %1299 = vrcp.f32 %v370_v9 }
 0x3e2   :  { %v1300_v11 = vpop.eup %1299 }
 0x3e3   :  { %v373_v13 = vsel %vm1490_vm4, %v1298_v10, %v1300_v11 }
 0x3e4   :  { %376 = vrot.lane.b32.xlu0 %v373_v13, %s1378_s0  ;;  %v374_v17 = vmul.f32 %v373_v13, %v279_v58 }
 0x456   :  { %v377_v15 = vpop.permute.xlu0 %376 }
 0x457   :  { %v379_v16 = vmul.f32 %v377_v15, %v373_v13 }
 0x459   :  { %381 = vrot.lane.b32.xlu1 %v379_v16, %s1379_s3 }
 0x4cb   :  { %v382_v18 = vpop.permute.xlu1 %381 }
 0x4cc   :  { %v384_v19 = vadd.f32 %v382_v18, %v374_v17 }
 0x4ce   :  { %1301 = vtanh.f32 %v384_v19 }
 0x4d8   :  { %v1302_v20 = vpop.eup %1301 }
 0x4d9   :  { %387 = vrot.lane.b32.xlu0 %v1302_v20, %s1378_s0 }
 0x54b   :  { %v388_v21 = vpop.permute.xlu0 %387 }
 0x54c   :  { %v390_v22 = vmul.f32 %v388_v21, %v373_v13 }
 0x54e   :  { %396 = vrot.lane.b32.xlu1 %v390_v22, %s1379_s3 }
 0x5c0   :  { %v397_v23 = vpop.permute.xlu1 %396 }
 0x5c1   :  { %1168 = vmatmul.mubr.msk.f32.vlgmr.msra.gmra.mrb[8].mxu0 %vm37_vm0, %v397_v23 }
 0x5c2   :  { %1259 = vmatpush3.bf16.msra.mxu0 %v1434_v12  ;;  %1189 = vmatprep.mubr.msk.f32.mxu0 %vm1376_vm1, %v1377_v8 }
 0x5c3   :  { %1260 = vmatprep.subr.bf16.mxu0 %v1375_v6 }
 0x5c6   :  { %1262 = vmatpush3.bf16.msra.mxu0 %v1440_v14 }
 0x5c7   :  { %1269 = vmatprep.subr.bf16.mxu0 %v1375_v6 }
 0x694   :  { %v466_v27 = vpop.f32.mrb[8].mxu0 }
 0x695   :  { %v470_v28 = vadd.f32 %v466_v27, %v394_v26  ;;  %v1169_v29 = vpop.f32.mrb[9].mxu0 }
 0x696   :  { %v707_v29 = vld [vmem:[#allocation2 + $0x5] ss:$8 sm:$0xf] }
 0x697   :  { %v1054_v30 = vmul.f32 -1.442695, %v470_v28 }
 0x699   :  { %1303 = vpow2.f32 %v1054_v30 }
 0x69a   :  { %1305 = vtanh.f32 %v470_v28  ;;  %v708_v28 = vld [vmem:[#allocation2 + $0x5] ss:$8 sm:$0xf0] }
 0x69b   :  { %v709_v30 = vor.u32 %v708_v28, %v707_v29 }
 0x6a3   :  { %v1304_v31 = vpop.eup %1303 }
 0x6a4   :  { %v475_v32 = vadd.f32 1.0, %v1304_v31  ;;  %v1306_v33 = vpop.eup %1305 }
 0x6a6   :  { %1307 = vrcp.f32 %v475_v32 }
 0x6b0   :  { %v1308_v34 = vpop.eup %1307 }
 0x6b1   :  { %v478_v35 = vsel %vm1490_vm4, %v1306_v33, %v1308_v34 }
 0x6b2   :  { %481 = vrot.lane.b32.xlu0 %v478_v35, %s1378_s0  ;;  %v479_v38 = vmul.f32 %v478_v35, %v384_v19 }
 0x724   :  { %v482_v36 = vpop.permute.xlu0 %481 }
 0x725   :  { %v484_v37 = vmul.f32 %v482_v36, %v478_v35 }
 0x727   :  { %486 = vrot.lane.b32.xlu1 %v484_v37, %s1379_s3 }
 0x799   :  { %v487_v39 = vpop.permute.xlu1 %486 }
 0x79a   :  { %v489_v40 = vadd.f32 %v487_v39, %v479_v38 }
 0x79c   :  { %1309 = vtanh.f32 %v489_v40 }
 0x7a6   :  { %v1310_v41 = vpop.eup %1309 }
 0x7a7   :  { %492 = vrot.lane.b32.xlu0 %v1310_v41, %s1378_s0 }
 0x819   :  { %v493_v42 = vpop.permute.xlu0 %492 }
 0x81a   :  { %v495_v43 = vmul.f32 %v493_v42, %v478_v35 }
 0x81c   :  { %501 = vrot.lane.b32.xlu1 %v495_v43, %s1379_s3 }
 0x88e   :  { %v502_v44 = vpop.permute.xlu1 %501 }
 0x88f   :  { %1179 = vmatmul.mubr.msk.f32.vlgmr.msra.gmra.mrb[4].mxu1 %vm37_vm0, %v502_v44 }
 0x890   :  { %1265 = vmatpush3.bf16.msra.mxu1 %v1434_v12  ;;  %1200 = vmatprep.mubr.msk.f32.mxu1 %vm1376_vm1, %v1377_v8 }
 0x891   :  { %1266 = vmatprep.subr.bf16.mxu1 %v1375_v6 }
 0x894   :  { %1268 = vmatpush3.bf16.msra.mxu1 %v1440_v14 }
 0x895   :  { %1275 = vmatprep.subr.bf16.mxu1 %v1375_v6 }
 0x962   :  { %v571_v48 = vpop.f32.mrb[4].mxu1 }
 0x963   :  { %v575_v49 = vadd.f32 %v571_v48, %v499_v47  ;;  %v1180_v51 = vpop.f32.mrb[5].mxu1  ;;  %v814_v47 = vor.u32 %v813_v45, %v812_v46 }
 0x965   :  { %v1056_v52 = vmul.f32 -1.442695, %v575_v49 }
 0x967   :  { %1311 = vpow2.f32 %v1056_v52 }
 0x968   :  { %1313 = vtanh.f32 %v575_v49 }
 0x971   :  { %v1312_v53 = vpop.eup %1311 }
 0x972   :  { %v580_v54 = vadd.f32 1.0, %v1312_v53  ;;  %v1314_v55 = vpop.eup %1313 }
 0x974   :  { %1315 = vrcp.f32 %v580_v54 }
 0x97e   :  { %v1316_v56 = vpop.eup %1315 }
 0x97f   :  { %v583_v57 = vsel %vm1490_vm4, %v1314_v55, %v1316_v56 }
 0x980   :  { %586 = vrot.lane.b32.xlu0 %v583_v57, %s1378_s0  ;;  %v584_v60 = vmul.f32 %v583_v57, %v489_v40 }
 0x9f2   :  { %v587_v58 = vpop.permute.xlu0 %586 }
 0x9f3   :  { %v589_v59 = vmul.f32 %v587_v58, %v583_v57 }
 0x9f5   :  { %591 = vrot.lane.b32.xlu1 %v589_v59, %s1379_s3 }
 0xa67   :  { %v592_v61 = vpop.permute.xlu1 %591 }
 0xa68   :  { %v594_v62 = vadd.f32 %v592_v61, %v584_v60 }
 0xa6a   :  { %1317 = vtanh.f32 %v594_v62 }
 0xa74   :  { %v1318_v63 = vpop.eup %1317 }
 0xa75   :  { %597 = vrot.lane.b32.xlu0 %v1318_v63, %s1378_s0 }
 0xae7   :  { %v598_v0 = vpop.permute.xlu0 %597 }
 0xae8   :  { %v600_v1 = vmul.f32 %v598_v0, %v583_v57 }
 0xaea   :  { %606 = vrot.lane.b32.xlu1 %v600_v1, %s1379_s3 }
 0xb5c   :  { %v607_v2 = vpop.permute.xlu1 %606 }
 0xb5d   :  { %1190 = vmatmul.mubr.msk.f32.vlgmr.msra.gmra.mrb[10].mxu0 %vm37_vm0, %v607_v2 }
 0xb5e   :  { %1271 = vmatpush3.bf16.msra.mxu0 %v1434_v12  ;;  %1211 = vmatprep.mubr.msk.f32.mxu0 %vm1376_vm1, %v1377_v8 }
 0xb5f   :  { %1272 = vmatprep.subr.bf16.mxu0 %v1375_v6 }
 0xb62   :  { %1274 = vmatpush3.bf16.msra.mxu0 %v1440_v14 }
 0xc30   :  { %v676_v7 = vpop.f32.mrb[10].mxu0 }
 0xc31   :  { %v680_v9 = vadd.f32 %v676_v7, %v604_v5  ;;  %v1191_v10 = vpop.f32.mrb[11].mxu0  ;;  %v919_v5 = vor.u32 %v918_v3, %v917_v4 }
 0xc33   :  { %v1058_v11 = vmul.f32 -1.442695, %v680_v9 }
 0xc35   :  { %1319 = vpow2.f32 %v1058_v11 }
 0xc36   :  { %1321 = vtanh.f32 %v680_v9 }
 0xc3f   :  { %v1320_v13 = vpop.eup %1319 }
 0xc40   :  { %v685_v15 = vadd.f32 1.0, %v1320_v13  ;;  %v1322_v16 = vpop.eup %1321 }
 0xc42   :  { %1323 = vrcp.f32 %v685_v15 }
 0xc4c   :  { %v1324_v17 = vpop.eup %1323 }
 0xc4d   :  { %v688_v18 = vsel %vm1490_vm4, %v1322_v16, %v1324_v17 }
 0xc4e   :  { %691 = vrot.lane.b32.xlu0 %v688_v18, %s1378_s0  ;;  %v689_v21 = vmul.f32 %v688_v18, %v594_v62 }
 0xcc0   :  { %v692_v19 = vpop.permute.xlu0 %691 }
 0xcc1   :  { %v694_v20 = vmul.f32 %v692_v19, %v688_v18 }
 0xcc3   :  { %696 = vrot.lane.b32.xlu1 %v694_v20, %s1379_s3 }
 0xd35   :  { %v697_v22 = vpop.permute.xlu1 %696 }
 0xd36   :  { %v699_v23 = vadd.f32 %v697_v22, %v689_v21 }
 0xd38   :  { %1325 = vtanh.f32 %v699_v23 }
 0xd42   :  { %v1326_v24 = vpop.eup %1325 }
 0xd43   :  { %702 = vrot.lane.b32.xlu0 %v1326_v24, %s1378_s0 }
 0xdb5   :  { %v703_v25 = vpop.permute.xlu0 %702 }
 0xdb6   :  { %v705_v26 = vmul.f32 %v703_v25, %v688_v18 }
 0xdb8   :  { %711 = vrot.lane.b32.xlu1 %v705_v26, %s1379_s3 }
 0xe2a   :  { %v712_v27 = vpop.permute.xlu1 %711 }
 0xe2b   :  { %1201 = vmatmul.mubr.msk.f32.vlgmr.msra.gmra.mrb[6].mxu1 %vm37_vm0, %v712_v27 }
 0xe2c   :  { %1277 = vmatpush3.bf16.msra.mxu1 %v1434_v12  ;;  %1222 = vmatprep.mubr.msk.f32.mxu1 %vm1376_vm1, %v1377_v8 }
 0xe2d   :  { %1278 = vmatprep.subr.bf16.mxu1 %v1375_v6 }
 0xe30   :  { %1280 = vmatpush3.bf16.msra.mxu1 %v1440_v14 }
 0xefe   :  { %v781_v31 = vpop.f32.mrb[6].mxu1 }
 0xeff   :  { %v785_v32 = vadd.f32 %v781_v31, %v709_v30  ;;  %v1202_v33 = vpop.f32.mrb[7].mxu1 }
 0xf01   :  { %v1060_v34 = vmul.f32 -1.442695, %v785_v32 }
 0xf03   :  { %1327 = vpow2.f32 %v1060_v34 }
 0xf04   :  { %1329 = vtanh.f32 %v785_v32 }
 0xf0d   :  { %v1328_v35 = vpop.eup %1327 }
 0xf0e   :  { %v790_v36 = vadd.f32 1.0, %v1328_v35  ;;  %v1330_v12 = vpop.eup %1329 }
 0xf10   :  { %1331 = vrcp.f32 %v790_v36 }
 0xf1a   :  { %v1332_v37 = vpop.eup %1331 }
 0xf1b   :  { %v793_v8 = vsel %vm1490_vm4, %v1330_v12, %v1332_v37 }
 0xf1c   :  { %796 = vrot.lane.b32.xlu0 %v793_v8, %s1378_s0  ;;  %v794_v38 = vmul.f32 %v793_v8, %v699_v23 }
 0xf8e   :  { %v797_v6 = vpop.permute.xlu0 %796 }
 0xf8f   :  { %v799_v14 = vmul.f32 %v797_v6, %v793_v8 }
 0xf91   :  { %801 = vrot.lane.b32.xlu1 %v799_v14, %s1379_s3 }
0x1003   :  { %v802_v39 = vpop.permute.xlu1 %801 }
0x1004   :  { %v804_v40 = vadd.f32 %v802_v39, %v794_v38 }
0x1006   :  { %1333 = vtanh.f32 %v804_v40 }
0x1010   :  { %v1334_v41 = vpop.eup %1333 }
0x1011   :  { %807 = vrot.lane.b32.xlu0 %v1334_v41, %s1378_s0 }
0x1083   :  { %v808_v42 = vpop.permute.xlu0 %807 }
0x1084   :  { %v810_v43 = vmul.f32 %v808_v42, %v793_v8 }
0x1086   :  { %816 = vrot.lane.b32.xlu1 %v810_v43, %s1379_s3 }
0x10f8   :  { %v817_v44 = vpop.permute.xlu1 %816 }
0x10f9   :  { %1212 = vmatmul.mubr.msk.f32.vlgmr.msra.gmra.mrb[12].mxu0 %vm37_vm0, %v817_v44 }
0x11cc   :  { %v886_v48 = vpop.f32.mrb[12].mxu0 }
0x11cd   :  { %v890_v49 = vadd.f32 %v886_v48, %v814_v47  ;;  %v1213_v51 = vpop.f32.mrb[13].mxu0 }
0x11cf   :  { %v1062_v52 = vmul.f32 -1.442695, %v890_v49 }
0x11d1   :  { %1335 = vpow2.f32 %v1062_v52 }
0x11d2   :  { %1337 = vtanh.f32 %v890_v49 }
0x11db   :  { %v1336_v53 = vpop.eup %1335 }
0x11dc   :  { %v895_v54 = vadd.f32 1.0, %v1336_v53  ;;  %v1338_v55 = vpop.eup %1337 }
0x11de   :  { %1339 = vrcp.f32 %v895_v54 }
0x11e8   :  { %v1340_v56 = vpop.eup %1339 }
0x11e9   :  { %v898_v57 = vsel %vm1490_vm4, %v1338_v55, %v1340_v56 }
0x11ea   :  { %901 = vrot.lane.b32.xlu0 %v898_v57, %s1378_s0  ;;  %v899_v60 = vmul.f32 %v898_v57, %v804_v40 }
0x125c   :  { %v902_v58 = vpop.permute.xlu0 %901 }
0x125d   :  { %v904_v59 = vmul.f32 %v902_v58, %v898_v57 }
0x125f   :  { %906 = vrot.lane.b32.xlu1 %v904_v59, %s1379_s3 }
0x12d1   :  { %v907_v61 = vpop.permute.xlu1 %906 }
0x12d2   :  { %v909_v62 = vadd.f32 %v907_v61, %v899_v60 }
0x12d4   :  { %1341 = vtanh.f32 %v909_v62 }
0x12de   :  { %v1342_v63 = vpop.eup %1341 }
0x12df   :  { %912 = vrot.lane.b32.xlu0 %v1342_v63, %s1378_s0 }
0x1351   :  { %v913_v0 = vpop.permute.xlu0 %912 }
0x1352   :  { %v915_v1 = vmul.f32 %v913_v0, %v898_v57 }
0x1354   :  { %921 = vrot.lane.b32.xlu1 %v915_v1, %s1379_s3 }
0x13c6   :  { %v922_v2 = vpop.permute.xlu1 %921 }
0x13c7   :  { %1223 = vmatmul.mubr.msk.f32.vlgmr.msra.gmra.mrb[8].mxu1 %vm37_vm0, %v922_v2 }
0x149a   :  { %v991_v7 = vpop.f32.mrb[8].mxu1 }
0x149b   :  { %v995_v9 = vadd.f32 %v991_v7, %v919_v5  ;;  %v1224_v10 = vpop.f32.mrb[9].mxu1 }
0x149d   :  { %v1064_v11 = vmul.f32 -1.442695, %v995_v9 }
0x149f   :  { %1343 = vpow2.f32 %v1064_v11 }
0x14a0   :  { %1345 = vtanh.f32 %v995_v9 }
0x14a9   :  { %v1344_v13 = vpop.eup %1343 }
0x14aa   :  { %v1000_v15 = vadd.f32 1.0, %v1344_v13  ;;  %v1346_v16 = vpop.eup %1345 }
0x14ac   :  { %1347 = vrcp.f32 %v1000_v15 }
0x14b6   :  { %v1348_v17 = vpop.eup %1347 }
0x14b7   :  { %v1003_v18 = vsel %vm1490_vm4, %v1346_v16, %v1348_v17 }
0x14b8   :  { %1006 = vrot.lane.b32.xlu0 %v1003_v18, %s1378_s0  ;;  %v1004_v21 = vmul.f32 %v1003_v18, %v909_v62 }
0x152a   :  { %v1007_v19 = vpop.permute.xlu0 %1006 }
0x152b   :  { %v1009_v20 = vmul.f32 %v1007_v19, %v1003_v18 }
0x152d   :  { %1011 = vrot.lane.b32.xlu1 %v1009_v20, %s1379_s3 }
0x159f   :  { %v1012_v22 = vpop.permute.xlu1 %1011 }
0x15a0   :  { %v1014_v23 = vadd.f32 %v1012_v22, %v1004_v21 }
0x15a2   :  { %1349 = vtanh.f32 %v1014_v23 }
0x15ac   :  { %v1350_v24 = vpop.eup %1349 }
0x15ad   :  { %1017 = vrot.lane.b32.xlu0 %v1350_v24, %s1378_s0 }
0x161f   :  { %v1018_v25 = vpop.permute.xlu0 %1017 }
0x1620   :  { %v1020_v26 = vmul.f32 %v1018_v25, %v1003_v18 }
0x1622   :  { %1022 = vrot.lane.b32.xlu1 %v1020_v26, %s1379_s3 }
0x1694   :  { %v1023_v50 = vpop.permute.xlu1 %1022 }
0x1695   :  { %1026 = vst.msk [vmem:[#allocation3] sm:$0x3] %vm1025_vm5, %v1023_v50 }
0x1696   :  { %1362 = shalt.err (!%p1359_p4)
}
0x1697   :  { %s1363_s26 = scalar_lea.hbm %s1593_s4, 32 }
0x1698   :  { %p1364_p5 = scmp.ne.s32.totalorder %s1593_s4, %s1363_s26  ;;  %p1367_p6 = scmp.lt.u32.totalorder %s1363_s26, %s1593_s4 }
0x169a   :  { %p1369_p7 = pnand %p1367_p6, %p1364_p5 }
0x169c   :  { %1372 = shalt.err (!%p1369_p7)
}
0x169d   :  { %1036 = dma.vmem_to_hbm [thread:$0]  %s1034_s22, 32, %s1593_s4, [#allocation4]  }
0x169e   :  { %1373 = dma.done.wait [#allocation4], 32  }
0x169f   :  { %1374 = vsyncadd [#allocation4], 4294967264 }
0x16a0   :  { %1040 = vsyncpa [#allocation4], 1 }

</bundles_post_ra>
